<compile_context>
chip_gen: v7x
topology: tpu7x:2x2x1
jax: 0.10.0
libtpu: 0.0.40
codegen_flags: <defaults>
</compile_context>

<pallas_src>
import math

import jax
import jax.numpy as jnp
from jax.experimental import pallas as pl
from jax.experimental.pallas import tpu as pltpu


def _round_up(x, m):
    return (x + m - 1) // m * m


def mlp_kernel(x_ref, w1_ref, b1_ref, w2_ref, b2_ref, w3_ref, b3_ref, o_ref):
    # x arrives f32; cast to bf16 in-kernel (cheap VPU op, saves HBM traffic
    # vs. casting in the wrapper).
    x_bf = x_ref[...].astype(jnp.bfloat16)
    # fc1 + ReLU   (bf16 operands, f32 MXU accumulation)
    h1 = jnp.dot(x_bf, w1_ref[...], preferred_element_type=jnp.float32)
    h1 = jnp.maximum(h1 + b1_ref[...], 0.0)
    # fc2 + ReLU
    h2 = jnp.dot(h1.astype(jnp.bfloat16), w2_ref[...],
                 preferred_element_type=jnp.float32)
    h2 = jnp.maximum(h2 + b2_ref[...], 0.0)
    # fc3 (no activation), lane-dense (128-multiple) output slab
    out = jnp.dot(h2.astype(jnp.bfloat16), w3_ref[...],
                  preferred_element_type=jnp.float32)
    o_ref[...] = (out + b3_ref[...]).astype(o_ref.dtype)


def continuous_policy_forward(x, params, tile_b=512):
    """Runs the fused MLP kernel. x: (B, input_dim) float32. Returns f32 (B, out_dim)."""
    w1, b1, w2, b2, w3, b3 = params
    B, input_dim = x.shape
    hidden = w1.shape[1]
    out_dim = w3.shape[1]

    # --- lane-dense output: pad out_dim to a multiple of 128 (unmasked stores) ---
    out_pad = _round_up(max(out_dim, 128), 128)
    w3p = jnp.zeros((hidden, out_pad), jnp.float32).at[:, :out_dim].set(w3)
    b3p = jnp.zeros((1, out_pad), jnp.float32).at[:, :out_dim].set(b3)

    # --- batch tiling: TILE_B multiple of 16 (bf16 sublane packing), pad B up ---
    tile_b = max(16, (tile_b // 16) * 16)
    TILE_B = min(tile_b, _round_up(B, 16))
    B_pad = _round_up(B, TILE_B)
    x_pad = x if B_pad == B else jnp.pad(x, ((0, B_pad - B), (0, 0)))

    # --- weights as bf16 MXU operands (grid-constant, DMA'd once) ---
    w1_bf = w1.astype(jnp.bfloat16)
    w2_bf = w2.astype(jnp.bfloat16)
    w3_bf = w3p.astype(jnp.bfloat16)

    grid = (B_pad // TILE_B,)
    out = pl.pallas_call(
        mlp_kernel,
        out_shape=jax.ShapeDtypeStruct((B_pad, out_pad), jnp.float32),
        grid=grid,
        in_specs=[
            # x tiles stream over the grid; weights/biases are grid-constant.
            pl.BlockSpec((TILE_B, input_dim), lambda i: (i, 0)),
            pl.BlockSpec((input_dim, hidden), lambda i: (0, 0)),
            pl.BlockSpec((1, hidden), lambda i: (0, 0)),
            pl.BlockSpec((hidden, hidden), lambda i: (0, 0)),
            pl.BlockSpec((1, hidden), lambda i: (0, 0)),
            pl.BlockSpec((hidden, out_pad), lambda i: (0, 0)),
            pl.BlockSpec((1, out_pad), lambda i: (0, 0)),
        ],
        out_specs=pl.BlockSpec((TILE_B, out_pad), lambda i: (i, 0)),
        compiler_params=pltpu.CompilerParams(
            dimension_semantics=("parallel",),   # shard batch tiles across TCs (v7x)
            vmem_limit_bytes=64 << 20,
        ),
    )(x_pad, w1_bf, b1, w2_bf, b2, w3_bf, b3p)

    return out[:B, :out_dim]


def init_params(key, input_dim, output_dim, hidden_size=32):
    """Deterministic PyTorch-style uniform(-1/sqrt(fan_in), +1/sqrt(fan_in)) init."""
    keys = jax.random.split(key, 6)

    def linear(kw, kb, fan_in, fan_out):
        bound = 1.0 / math.sqrt(fan_in)
        w = jax.random.uniform(kw, (fan_in, fan_out), jnp.float32, -bound, bound)
        b = jax.random.uniform(kb, (1, fan_out), jnp.float32, -bound, bound)
        return w, b

    w1, b1 = linear(keys[0], keys[1], input_dim, hidden_size)
    w2, b2 = linear(keys[2], keys[3], hidden_size, hidden_size)
    w3, b3 = linear(keys[4], keys[5], hidden_size, output_dim)
    return (w1, b1, w2, b2, w3, b3)


def reference_forward_f32(x, params):
    w1, b1, w2, b2, w3, b3 = params
    h1 = jnp.maximum(x @ w1 + b1, 0.0)
    h2 = jnp.maximum(h1 @ w2 + b2, 0.0)
    return h2 @ w3 + b3


def reference_forward_bf16(x, params):
    """Same bf16-operand / f32-accumulate path as the kernel, for tight validation."""
    w1, b1, w2, b2, w3, b3 = params
    h1 = jnp.dot(x.astype(jnp.bfloat16), w1.astype(jnp.bfloat16),
                 preferred_element_type=jnp.float32)
    h1 = jnp.maximum(h1 + b1, 0.0)
    h2 = jnp.dot(h1.astype(jnp.bfloat16), w2.astype(jnp.bfloat16),
                 preferred_element_type=jnp.float32)
    h2 = jnp.maximum(h2 + b2, 0.0)
    out = jnp.dot(h2.astype(jnp.bfloat16), w3.astype(jnp.bfloat16),
                  preferred_element_type=jnp.float32)
    return out + b3


if __name__ == "__main__":
    key = jax.random.PRNGKey(0)
    k_x, k_p = jax.random.split(key)

    batch, input_dim, hidden_size, output_dim = 8, 16, 32, 4
    x = jax.random.normal(k_x, (batch, input_dim), jnp.float32)
    params = init_params(k_p, input_dim, output_dim, hidden_size)

    out = continuous_policy_forward(x, params)
    out = jax.block_until_ready(out)
    assert out.shape == (batch, output_dim)

    # Tight check against a reference that takes the same bf16-operand path.
    ref_bf16 = reference_forward_bf16(x, params)
    assert jnp.allclose(out, ref_bf16, atol=2e-3, rtol=2e-3), "mismatch vs bf16 reference"

    # Loose semantic check against the full-f32 PyTorch-equivalent forward.
    ref_f32 = reference_forward_f32(x, params)
    assert jnp.allclose(out, ref_f32, atol=5e-2, rtol=5e-2), "mismatch vs f32 reference"

    print("KERNEL_OK")
</pallas_src>

<mosaic_0001>
module attributes {stable_mosaic.version = 11 : i64} {
  func.func @mlp_kernel(%arg0: i32, %arg1: memref<16x16xf32, #tpu.memory_space<vmem>>, %arg2: memref<16x32xbf16, #tpu.memory_space<vmem>>, %arg3: memref<1x32xf32, #tpu.memory_space<vmem>>, %arg4: memref<32x32xbf16, #tpu.memory_space<vmem>>, %arg5: memref<1x32xf32, #tpu.memory_space<vmem>>, %arg6: memref<32x128xbf16, #tpu.memory_space<vmem>>, %arg7: memref<1x128xf32, #tpu.memory_space<vmem>>, %arg8: memref<16x128xf32, #tpu.memory_space<vmem>>) attributes {dimension_semantics = [#tpu.dimension_semantics<parallel>], iteration_bounds = array<i64: 1>, scalar_prefetch = 0 : i64, scratch_operands = 0 : i64, tpu.core_type = #tpu.core_type<tc>, window_params = [{transform_indices = @transform_0, window_bounds = array<i64: 16, 16>}, {pipeline_mode = #tpu.pipeline_mode<synchronous>, transform_indices = @transform_1, window_bounds = array<i64: 16, 32>}, {pipeline_mode = #tpu.pipeline_mode<synchronous>, transform_indices = @transform_2, window_bounds = array<i64: 1, 32>}, {pipeline_mode = #tpu.pipeline_mode<synchronous>, transform_indices = @transform_3, window_bounds = array<i64: 32, 32>}, {pipeline_mode = #tpu.pipeline_mode<synchronous>, transform_indices = @transform_4, window_bounds = array<i64: 1, 32>}, {pipeline_mode = #tpu.pipeline_mode<synchronous>, transform_indices = @transform_5, window_bounds = array<i64: 32, 128>}, {pipeline_mode = #tpu.pipeline_mode<synchronous>, transform_indices = @transform_6, window_bounds = array<i64: 1, 128>}, {transform_indices = @transform_7, window_bounds = array<i64: 16, 128>}]} {
    %c0 = arith.constant 0 : index
    %c0_0 = arith.constant 0 : index
    %0 = vector.load %arg1[%c0, %c0_0] : memref<16x16xf32, #tpu.memory_space<vmem>>, vector<16x16xf32>
    %1 = arith.truncf %0 : vector<16x16xf32> to vector<16x16xbf16>
    %c0_1 = arith.constant 0 : index
    %c0_2 = arith.constant 0 : index
    %2 = vector.load %arg2[%c0_1, %c0_2] : memref<16x32xbf16, #tpu.memory_space<vmem>>, vector<16x32xbf16>
    %cst = arith.constant dense<0.000000e+00> : vector<16x32xf32>
    %3 = tpu.matmul %1, %2, %cst {dimension_numbers = #tpu.dot_dimension_numbers<[1], [0], [0], [1], [0, 0, 1, 1], [], []>} : vector<16x16xbf16>, vector<16x32xbf16>, vector<16x32xf32> -> vector<16x32xf32>
    %c0_3 = arith.constant 0 : index
    %c0_4 = arith.constant 0 : index
    %4 = vector.load %arg3[%c0_3, %c0_4] : memref<1x32xf32, #tpu.memory_space<vmem>>, vector<1x32xf32>
    %5 = vector.broadcast %4 : vector<1x32xf32> to vector<16x32xf32>
    %6 = arith.addf %3, %5 : vector<16x32xf32>
    %cst_5 = arith.constant 0.000000e+00 : f32
    %7 = vector.broadcast %cst_5 : f32 to vector<16x32xf32>
    %8 = arith.maximumf %6, %7 : vector<16x32xf32>
    %9 = arith.truncf %8 : vector<16x32xf32> to vector<16x32xbf16>
    %c0_6 = arith.constant 0 : index
    %c0_7 = arith.constant 0 : index
    %10 = vector.load %arg4[%c0_6, %c0_7] : memref<32x32xbf16, #tpu.memory_space<vmem>>, vector<32x32xbf16>
    %cst_8 = arith.constant dense<0.000000e+00> : vector<16x32xf32>
    %11 = tpu.matmul %9, %10, %cst_8 {dimension_numbers = #tpu.dot_dimension_numbers<[1], [0], [0], [1], [0, 0, 1, 1], [], []>} : vector<16x32xbf16>, vector<32x32xbf16>, vector<16x32xf32> -> vector<16x32xf32>
    %c0_9 = arith.constant 0 : index
    %c0_10 = arith.constant 0 : index
    %12 = vector.load %arg5[%c0_9, %c0_10] : memref<1x32xf32, #tpu.memory_space<vmem>>, vector<1x32xf32>
    %13 = vector.broadcast %12 : vector<1x32xf32> to vector<16x32xf32>
    %14 = arith.addf %11, %13 : vector<16x32xf32>
    %cst_11 = arith.constant 0.000000e+00 : f32
    %15 = vector.broadcast %cst_11 : f32 to vector<16x32xf32>
    %16 = arith.maximumf %14, %15 : vector<16x32xf32>
    %17 = arith.truncf %16 : vector<16x32xf32> to vector<16x32xbf16>
    %c0_12 = arith.constant 0 : index
    %c0_13 = arith.constant 0 : index
    %18 = vector.load %arg6[%c0_12, %c0_13] : memref<32x128xbf16, #tpu.memory_space<vmem>>, vector<32x128xbf16>
    %cst_14 = arith.constant dense<0.000000e+00> : vector<16x128xf32>
    %19 = tpu.matmul %17, %18, %cst_14 {dimension_numbers = #tpu.dot_dimension_numbers<[1], [0], [0], [1], [0, 0, 1, 1], [], []>} : vector<16x32xbf16>, vector<32x128xbf16>, vector<16x128xf32> -> vector<16x128xf32>
    %c0_15 = arith.constant 0 : index
    %c0_16 = arith.constant 0 : index
    %20 = vector.load %arg7[%c0_15, %c0_16] : memref<1x128xf32, #tpu.memory_space<vmem>>, vector<1x128xf32>
    %21 = vector.broadcast %20 : vector<1x128xf32> to vector<16x128xf32>
    %22 = arith.addf %19, %21 : vector<16x128xf32>
    %c0_17 = arith.constant 0 : index
    %c0_18 = arith.constant 0 : index
    %23 = vector.load %arg8[%c0_17, %c0_18] : memref<16x128xf32, #tpu.memory_space<vmem>>, vector<16x128xf32>
    tpu.vector_store %arg8[%c0_17, %c0_18], %22 {strides = array<i32>} : memref<16x128xf32, #tpu.memory_space<vmem>>, vector<16x128xf32>,
    return
  }
  func.func @transform_0(%arg0: i32) -> (i32, i32) {
    %c0_i32 = arith.constant 0 : i32
    %c0_i32_0 = arith.constant 0 : i32
    return %arg0, %c0_i32 : i32, i32
  }
  func.func @transform_1(%arg0: i32) -> (i32, i32) {
    %c0_i32 = arith.constant 0 : i32
    %c0_i32_0 = arith.constant 0 : i32
    %c0_i32_1 = arith.constant 0 : i32
    return %c0_i32, %c0_i32_0 : i32, i32
  }
  func.func @transform_2(%arg0: i32) -> (i32, i32) {
    %c0_i32 = arith.constant 0 : i32
    %c0_i32_0 = arith.constant 0 : i32
    %c0_i32_1 = arith.constant 0 : i32
    return %c0_i32, %c0_i32_0 : i32, i32
  }
  func.func @transform_3(%arg0: i32) -> (i32, i32) {
    %c0_i32 = arith.constant 0 : i32
    %c0_i32_0 = arith.constant 0 : i32
    %c0_i32_1 = arith.constant 0 : i32
    return %c0_i32, %c0_i32_0 : i32, i32
  }
  func.func @transform_4(%arg0: i32) -> (i32, i32) {
    %c0_i32 = arith.constant 0 : i32
    %c0_i32_0 = arith.constant 0 : i32
    %c0_i32_1 = arith.constant 0 : i32
    return %c0_i32, %c0_i32_0 : i32, i32
  }
  func.func @transform_5(%arg0: i32) -> (i32, i32) {
    %c0_i32 = arith.constant 0 : i32
    %c0_i32_0 = arith.constant 0 : i32
    %c0_i32_1 = arith.constant 0 : i32
    return %c0_i32, %c0_i32_0 : i32, i32
  }
  func.func @transform_6(%arg0: i32) -> (i32, i32) {
    %c0_i32 = arith.constant 0 : i32
    %c0_i32_0 = arith.constant 0 : i32
    %c0_i32_1 = arith.constant 0 : i32
    return %c0_i32, %c0_i32_0 : i32, i32
  }
  func.func @transform_7(%arg0: i32) -> (i32, i32) {
    %c0_i32 = arith.constant 0 : i32
    %c0_i32_0 = arith.constant 0 : i32
    return %arg0, %c0_i32 : i32, i32
  }
}

</mosaic_0001>

<bundles_post_ra>
// kernel: tpu_custom_call.1
= control target key start
LH: loop header
LB: loop body
LE: loop exit
PB: predicated region body
PF: predicated region fallthrough
CT: control target
= control target key end

     0   :  { %12 = vsyncpa [#allocation3], 0  ;;  %s756_s0 = inlined_call_operand.hbm [shape: f32[16,16], index: 0, kind: input, shape index: {}]   ;;  %s757_s1 = inlined_call_operand.hbm [shape: bf16[16,32], index: 1, kind: input, shape index: {}]   ;;  %s758_s2 = inlined_call_operand.hbm [shape: f32[1,32], index: 2, kind: input, shape index: {}]   ;;  %s759_s3 = inlined_call_operand.hbm [shape: bf16[32,32], index: 3, kind: input, shape index: {}]   ;;  %s760_s4 = inlined_call_operand.hbm [shape: f32[1,32], index: 4, kind: input, shape index: {}]   ;;  %s761_s5 = inlined_call_operand.hbm [shape: bf16[32,128], index: 5, kind: input, shape index: {}]   ;;  %s762_s6 = inlined_call_operand.hbm [shape: f32[1,128], index: 6, kind: input, shape index: {}]   ;;  %s763_s7 = inlined_call_operand.hbm [shape: f32[16,128], index: 7, kind: output, shape index: {}]  }
   0x1   :  { %13 = vsyncpa [#allocation6], 0 }
   0x2   :  { %14 = vsyncpa [#allocation9], 0 }
   0x3   :  { %15 = vsyncpa [#allocation12], 0 }
   0x4   :  { %16 = vsyncpa [#allocation4], 0  ;;  %s589_s24 = smov [#allocation5]   ;;  %s403_s28 = scalar_lea.hbm %s757_s1, 128 }
   0x5   :  { %s34_s25 = sshll.u32 %s589_s24, 4  ;;  %p404_p0 = scmp.ne.s32.totalorder %s757_s1, %s403_s28  ;;  %s35_s25 = int_to_ptr.vmem [resolvable:$true] %s34_s25 }
   0x6   :  { %p407_p1 = scmp.lt.u32.totalorder %s403_s28, %s757_s1 }
   0x8   :  { %p409_p2 = pnand %p407_p1, %p404_p0 }
   0xa   :  { %412 = shalt.err (!%p409_p2)
}
   0xb   :  { %s413_s10 = scalar_lea.vmem %s35_s25, 128  ;;  %p418_p4 = scmp.lt.s32.totalorder %s35_s25, %s35_s25 }
   0xc   :  { %p414_p3 = scmp.ne.s32.totalorder %s35_s25, %s413_s10  ;;  %p419_p5 = scmp.lt.s32.totalorder %s413_s10, %s413_s10 }
   0xe   :  { %p420_p6 = por %p419_p5, %p418_p4 }
  0x10   :  { %p421_p7 = pnand %p420_p6, %p414_p3 }
  0x12   :  { %424 = shalt.err (!%p421_p7)
}
  0x13   :  { %s590_s11 = smov 64   ;;  %s591_s12 = smov 4  }
  0x14   :  { %40 = dma.hbm_to_vmem [thread:$0]  %s757_s1, 128, %s35_s25, [#allocation6], %s590_s11, %s590_s11, %s591_s12  }
  0x15   :  { %s592_s15 = smov [#allocation8]   ;;  %s593_s17 = smov [#allocation11]  }
  0x16   :  { %s56_s16 = sshll.u32 %s592_s15, 4  ;;  %s78_s18 = sshll.u32 %s593_s17, 4  ;;  %s57_s16 = int_to_ptr.vmem [resolvable:$true] %s56_s16  ;;  %s79_s18 = int_to_ptr.vmem [resolvable:$true] %s78_s18 }
  0x17   :  { %s425_s21 = scalar_lea.hbm %s759_s3, 256 }
  0x18   :  { %p426_p8 = scmp.ne.s32.totalorder %s759_s3, %s425_s21  ;;  %p429_p9 = scmp.lt.u32.totalorder %s425_s21, %s759_s3 }
  0x1a   :  { %p431_p10 = pnand %p429_p9, %p426_p8 }
  0x1c   :  { %434 = shalt.err (!%p431_p10)
}
  0x1d   :  { %s435_s1 = scalar_lea.vmem %s57_s16, 256  ;;  %p440_p12 = scmp.lt.s32.totalorder %s57_s16, %s57_s16 }
  0x1e   :  { %p436_p11 = scmp.ne.s32.totalorder %s57_s16, %s435_s1  ;;  %p441_p13 = scmp.lt.s32.totalorder %s435_s1, %s435_s1 }
  0x20   :  { %p442_p0 = por %p441_p13, %p440_p12 }
  0x22   :  { %p443_p1 = pnand %p442_p0, %p436_p11 }
  0x24   :  { %446 = shalt.err (!%p443_p1)
}
  0x25   :  { %62 = dma.hbm_to_vmem [thread:$0]  %s759_s3, 256, %s57_s16, [#allocation9], %s590_s11, %s590_s11, %s591_s12  }
  0x26   :  { %s447_s30 = scalar_lea.hbm %s761_s5, 256 }
  0x27   :  { %p448_p2 = scmp.ne.s32.totalorder %s761_s5, %s447_s30  ;;  %p451_p3 = scmp.lt.u32.totalorder %s447_s30, %s761_s5 }
  0x29   :  { %p453_p4 = pnand %p451_p3, %p448_p2 }
  0x2b   :  { %456 = shalt.err (!%p453_p4)
}
  0x2c   :  { %s457_s14 = scalar_lea.vmem %s79_s18, 256  ;;  %p462_p6 = scmp.lt.s32.totalorder %s79_s18, %s79_s18 }
  0x2d   :  { %p458_p5 = scmp.ne.s32.totalorder %s79_s18, %s457_s14  ;;  %p463_p7 = scmp.lt.s32.totalorder %s457_s14, %s457_s14 }
  0x2f   :  { %p464_p8 = por %p463_p7, %p462_p6 }
  0x31   :  { %p465_p9 = pnand %p464_p8, %p458_p5 }
  0x33   :  { %468 = shalt.err (!%p465_p9)
}
  0x34   :  { %84 = dma.hbm_to_vmem [thread:$0]  %s761_s5, 256, %s79_s18, [#allocation12], %s590_s11, %s590_s11, %s591_s12  }
  0x35   :  { %s594_s16 = smov [#allocation2]   ;;  %s469_s21 = scalar_lea.hbm %s756_s0, 256 }
  0x36   :  { %s22_s17 = sshll.u32 %s594_s16, 4  ;;  %p470_p10 = scmp.ne.s32.totalorder %s756_s0, %s469_s21  ;;  %s23_s17 = int_to_ptr.vmem [resolvable:$true] %s22_s17 }
  0x37   :  { %p473_p11 = scmp.lt.u32.totalorder %s469_s21, %s756_s0 }
  0x39   :  { %p475_p12 = pnand %p473_p11, %p470_p10 }
  0x3b   :  { %478 = shalt.err (!%p475_p12)
}
  0x3c   :  { %s479_s1 = scalar_lea.vmem %s23_s17, 256  ;;  %p484_p0 = scmp.lt.s32.totalorder %s23_s17, %s23_s17 }
  0x3d   :  { %p480_p13 = scmp.ne.s32.totalorder %s23_s17, %s479_s1  ;;  %p485_p1 = scmp.lt.s32.totalorder %s479_s1, %s479_s1 }
  0x3f   :  { %p486_p2 = por %p485_p1, %p484_p0 }
  0x41   :  { %p487_p3 = pnand %p486_p2, %p480_p13 }
  0x43   :  { %490 = shalt.err (!%p487_p3)
}
  0x44   :  { %s595_s5 = smov 128   ;;  %s596_s11 = smov 8  }
  0x45   :  { %28 = dma.hbm_to_vmem [thread:$0]  %s756_s0, 256, %s23_s17, [#allocation3], %s595_s5, %s595_s5, %s596_s11  }
  0x46   :  { %s597_s25 = smov [#allocation7]   ;;  %s598_s28 = smov [#allocation10]  }
  0x47   :  { %s47_s27 = sshll.u32 %s597_s25, 4  ;;  %s69_s29 = sshll.u32 %s598_s28, 4  ;;  %s48_s27 = int_to_ptr.vmem [resolvable:$true] %s47_s27  ;;  %s70_s29 = int_to_ptr.vmem [resolvable:$true] %s69_s29 }
  0x48   :  { %s491_s9 = scalar_lea.hbm %s758_s2, 16 }
  0x49   :  { %p492_p4 = scmp.ne.s32.totalorder %s758_s2, %s491_s9  ;;  %p495_p5 = scmp.lt.u32.totalorder %s491_s9, %s758_s2 }
  0x4b   :  { %p497_p6 = pnand %p495_p5, %p492_p4 }
  0x4d   :  { %500 = shalt.err (!%p497_p6)
}
  0x4e   :  { %s501_s0 = scalar_lea.vmem %s48_s27, 16  ;;  %s505_s15 = scalar_lea.vmem %s48_s27, 32 }
  0x4f   :  { %p502_p7 = scmp.ne.s32.totalorder %s48_s27, %s501_s0  ;;  %p506_p8 = scmp.lt.s32.totalorder %s48_s27, %s48_s27 }
  0x50   :  { %p507_p9 = scmp.lt.s32.totalorder %s505_s15, %s501_s0 }
  0x52   :  { %p508_p10 = por %p507_p9, %p506_p8 }
  0x54   :  { %p509_p11 = pnand %p508_p10, %p502_p7 }
  0x56   :  { %512 = shalt.err (!%p509_p11)
}
  0x57   :  { %50 = dma.hbm_to_vmem [thread:$0]  %s758_s2, 16, %s48_s27, [#allocation6]  }
  0x58   :  { %s513_s21 = scalar_lea.hbm %s760_s4, 16 }
  0x59   :  { %p514_p12 = scmp.ne.s32.totalorder %s760_s4, %s513_s21  ;;  %p517_p13 = scmp.lt.u32.totalorder %s513_s21, %s760_s4 }
  0x5b   :  { %p519_p0 = pnand %p517_p13, %p514_p12 }
  0x5d   :  { %522 = shalt.err (!%p519_p0)
}
  0x5e   :  { %s523_s1 = scalar_lea.vmem %s70_s29, 16  ;;  %s527_s12 = scalar_lea.vmem %s70_s29, 32 }
  0x5f   :  { %p524_p1 = scmp.ne.s32.totalorder %s70_s29, %s523_s1  ;;  %p528_p2 = scmp.lt.s32.totalorder %s70_s29, %s70_s29 }
  0x60   :  { %p529_p3 = scmp.lt.s32.totalorder %s527_s12, %s523_s1 }
  0x62   :  { %p530_p4 = por %p529_p3, %p528_p2 }
  0x64   :  { %p531_p5 = pnand %p530_p4, %p524_p1 }
  0x66   :  { %534 = shalt.err (!%p531_p5)
}
  0x67   :  { %72 = dma.hbm_to_vmem [thread:$0]  %s760_s4, 16, %s70_s29, [#allocation9]  }
  0x68   :  { %s599_s25 = smov [#allocation13]   ;;  %s535_s8 = scalar_lea.hbm %s762_s6, 16 }
  0x69   :  { %s91_s27 = sshll.u32 %s599_s25, 4  ;;  %p536_p6 = scmp.ne.s32.totalorder %s762_s6, %s535_s8  ;;  %s92_s27 = int_to_ptr.vmem [resolvable:$true] %s91_s27 }
  0x6a   :  { %p539_p7 = scmp.lt.u32.totalorder %s535_s8, %s762_s6 }
  0x6c   :  { %p541_p8 = pnand %p539_p7, %p536_p6 }
  0x6e   :  { %544 = shalt.err (!%p541_p8)
}
  0x6f   :  { %s545_s3 = scalar_lea.vmem %s92_s27, 16  ;;  %s549_s4 = scalar_lea.vmem %s92_s27, 32 }
  0x70   :  { %p546_p9 = scmp.ne.s32.totalorder %s92_s27, %s545_s3  ;;  %p550_p10 = scmp.lt.s32.totalorder %s92_s27, %s92_s27 }
  0x71   :  { %p551_p11 = scmp.lt.s32.totalorder %s549_s4, %s545_s3 }
  0x73   :  { %p552_p12 = por %p551_p11, %p550_p10 }
  0x75   :  { %p553_p13 = pnand %p552_p12, %p546_p9 }
  0x77   :  { %556 = shalt.err (!%p553_p13)
}
  0x78   :  { %94 = dma.hbm_to_vmem [thread:$0]  %s762_s6, 16, %s92_s27, [#allocation12]  }
  0x79   :  { %579 = dma.done.wait [#allocation3], 256  }
  0x7a   :  { %580 = vsyncadd [#allocation3], 4294967040 }
  0x7b   :  { %581 = dma.done.wait [#allocation6], 144  }
  0x7c   :  { %582 = vsyncadd [#allocation6], 4294967152 }
  0x7d   :  { %583 = dma.done.wait [#allocation9], 272  }
  0x7e   :  { %584 = vsyncadd [#allocation9], 4294967024 }
  0x7f   :  { %585 = dma.done.wait [#allocation12], 272  }
  0x80   :  { %586 = vsyncadd [#allocation12], 4294967024  ;;  %v600_v0 = vmov 0.0   ;;  %vm601_vm0 = vmmov 0   ;;  %v398_v1 = vld [vmem:[#allocation5] sm:$0xff]   ;;  %v117_v2 = vld [vmem:[#allocation2] sm:$0xff] }
  0x81   :  { %362 = vmatprep.subr.bf16.mxu0 %v600_v0  ;;  %364 = vmatprep.mubr.msk.bf16.mxu0 %vm601_vm0, %v600_v0  ;;  %v118_v3 = vld [vmem:[#allocation2 + $0x8] sm:$0xff]  ;;  %vm135_vm1 = vcmask 130048   ;;  %v399_v5 = vld [vmem:[#allocation8] sm:$0xff]   ;;  %v343_v7 = vld [vmem:[#allocation7] ss:$0 sm:$0xff]  ;;  %vm206_vm2 = vcmask 261120  }
  0x82   :  { %368 = vmatprep.subr.bf16.mxu1 %v600_v0  ;;  %372 = vmatprep.mubr.msk.bf16.mxu1 %vm601_vm0, %v600_v0  ;;  %v119_v4 = vpack.c.bf16 %v118_v3, %v117_v2  ;;  %v400_v6 = vld [vmem:[#allocation8 + $0x8] sm:$0xff]   ;;  %v401_v17 = vld [vmem:[#allocation11] sm:$0xff]   ;;  %v402_v18 = vld [vmem:[#allocation11 + $0x8] sm:$0xff]   ;;  %s602_s6 = smov [#allocation14]  }
  0x83   :  { %363 = vmatpush3.bf16.msra.mxu0 %v398_v1  ;;  %369 = vmatpush3.bf16.msra.mxu1 %v399_v5  ;;  %v346_v19 = vld [vmem:[#allocation10] ss:$0 sm:$0xff]  ;;  %v350_v29 = vld [vmem:[#allocation13] ss:$0 sm:$0xff]  ;;  %s328_s15 = sshll.u32 %s602_s6, 4  ;;  %s329_s15 = int_to_ptr.vmem [resolvable:$true] %s328_s15 }
  0x84   :  { %376 = vmatprep.subr.bf16.mxu0 %v600_v0  ;;  %370 = vmatprep.subr.bf16.mxu1 %v600_v0  ;;  %s557_s16 = scalar_lea.vmem %s329_s15, 256  ;;  %p562_p1 = scmp.lt.s32.totalorder %s329_s15, %s329_s15 }
  0x85   :  { %p558_p0 = scmp.ne.s32.totalorder %s329_s15, %s557_s16  ;;  %p563_p2 = scmp.lt.s32.totalorder %s557_s16, %s557_s16 }
  0x86   :  { %365 = vmatmul.mubr.msk.bf16.vlgmr.msra.gmra.mrb[0].mxu0 %vm135_vm1, %v119_v4 }
  0x87   :  { %380 = vmatprep.mubr.msk.bf16.mxu0 %vm601_vm0, %v600_v0  ;;  %371 = vmatpush3.bf16.msra.mxu1 %v400_v6  ;;  %p564_p3 = por %p563_p2, %p562_p1 }
  0x88   :  { %377 = vmatpush3.bf16.msra.mxu0 %v401_v17 }
  0x89   :  { %378 = vmatprep.subr.bf16.mxu0 %v600_v0  ;;  %p565_p4 = pnand %p564_p3, %p558_p0 }
  0x8c   :  { %379 = vmatpush3.bf16.msra.mxu0 %v402_v18 }
 0x159   :  { %v173_v8 = vpop.f32.mrb[0].mxu0 }
 0x15a   :  { %v174_v9 = vadd.f32 %v343_v7, %v173_v8  ;;  %v366_v10 = vpop.f32.mrb[1].mxu0 }
 0x15b   :  { %v176_v11 = vpop.f32.mrb[2].mxu0 }
 0x15c   :  { %v177_v12 = vadd.f32 %v343_v7, %v176_v11  ;;  %v367_v13 = vpop.f32.mrb[3].mxu0  ;;  %v180_v14 = vmax.f32 %v174_v9, 0.0 }
 0x15e   :  { %v181_v15 = vmax.f32 %v177_v12, 0.0 }
 0x160   :  { %v182_v16 = vpack.c.bf16 %v181_v15, %v180_v14 }
 0x162   :  { %373 = vmatmul.mubr.msk.bf16.vlgmr.msra.gmra.mrb[0].mxu1 %vm206_vm2, %v182_v16 }
 0x235   :  { %v244_v20 = vpop.f32.mrb[0].mxu1 }
 0x236   :  { %v245_v21 = vadd.f32 %v346_v19, %v244_v20  ;;  %v374_v22 = vpop.f32.mrb[1].mxu1 }
 0x237   :  { %v247_v23 = vpop.f32.mrb[2].mxu1 }
 0x238   :  { %v248_v24 = vadd.f32 %v346_v19, %v247_v23  ;;  %v375_v25 = vpop.f32.mrb[3].mxu1  ;;  %v251_v26 = vmax.f32 %v245_v21, 0.0 }
 0x23a   :  { %v252_v27 = vmax.f32 %v248_v24, 0.0 }
 0x23c   :  { %v253_v28 = vpack.c.bf16 %v252_v27, %v251_v26 }
 0x23e   :  { %381 = vmatmul.mubr.msk.bf16.vlgmr.msra.gmra.mrb[4].mxu0 %vm206_vm2, %v253_v28 }
 0x311   :  { %v314_v30 = vpop.f32.mrb[4].mxu0 }
 0x312   :  { %v315_v31 = vadd.f32 %v350_v29, %v314_v30  ;;  %v382_v32 = vpop.f32.mrb[5].mxu0 }
 0x313   :  { %v317_v33 = vpop.f32.mrb[6].mxu0 }
 0x314   :  { %321 = vst [vmem:[#allocation14] sm:$0xff] %v315_v31  ;;  %v318_v34 = vadd.f32 %v350_v29, %v317_v33  ;;  %v383_v35 = vpop.f32.mrb[7].mxu0 }
 0x316   :  { %322 = vst [vmem:[#allocation14 + $0x8] sm:$0xff] %v318_v34 }
 0x317   :  { %568 = shalt.err (!%p565_p4)
}
 0x318   :  { %s569_s20 = scalar_lea.hbm %s763_s7, 256 }
 0x319   :  { %p570_p5 = scmp.ne.s32.totalorder %s763_s7, %s569_s20  ;;  %p573_p6 = scmp.lt.u32.totalorder %s569_s20, %s763_s7 }
 0x31b   :  { %p575_p7 = pnand %p573_p6, %p570_p5 }
 0x31d   :  { %578 = shalt.err (!%p575_p7)
}
 0x31e   :  { %334 = dma.vmem_to_hbm [thread:$0]  %s329_s15, 256, %s763_s7, [#allocation4], %s595_s5, %s595_s5, %s596_s11  }
 0x31f   :  { %587 = dma.done.wait [#allocation4], 256  }
 0x320   :  { %588 = vsyncadd [#allocation4], 4294967040 }
 0x321   :  { %338 = vsyncpa [#allocation3], 1 }
 0x322   :  { %339 = vsyncpa [#allocation6], 1 }
 0x323   :  { %340 = vsyncpa [#allocation9], 1 }
 0x324   :  { %341 = vsyncpa [#allocation12], 1 }
 0x325   :  { %342 = vsyncpa [#allocation4], 1 }

</bundles_post_ra>
